<compile_context>
chip_gen: v7x
topology: tpu7x:2x2x1
jax: 0.10.0
libtpu: 0.0.40
codegen_flags: <defaults>
</compile_context>

<pallas_src>
import functools

import jax
import jax.numpy as jnp
from jax import lax
from jax.experimental import pallas as pl
from jax.experimental.pallas import tpu as pltpu

_VMEM_LIMIT = 64 * 1024 * 1024


def _round_up(n, m):
    return (n + m - 1) // m * m


def _attn_tiles(n, batch):
    """Return (n_pad, tq, tk) with tq % tk == 0 and n_pad % tq == 0.

    Large Q tiles are the main lever: K/V are re-streamed from HBM once per Q
    tile, so arithmetic intensity ~ tq FLOP/byte.  tq targets 512, tk targets
    256.  Small sequences pad up to a bf16-friendly tile (multiple of 16) and
    are masked, never producing a full-extent (N, N) score block.
    """
    if n <= 256:
        t = _round_up(n, 16)          # bf16 min sublane tile is 16
        return t, t, t
    tk = 256
    tq = 512 if n >= 512 else 256
    # Keep >= 2 grid steps over (batch, q-tiles) so both v7x TensorCores get work.
    while tq > tk and batch * (_round_up(n, tq) // tq) < 2:
        tq //= 2
    n_pad = _round_up(n, tq)
    return n_pad, tq, tk


# ---------------------------------------------------------------------------
# Pass 1: fused QKV projection.  grid = (B, N_pad // TN)
# ---------------------------------------------------------------------------
def _qkv_proj_kernel(x_ref, wq_ref, wk_ref, wv_ref, bq_ref, bk_ref, bv_ref,
                     q_ref, k_ref, v_ref):
    # Fused f32 -> bf16 cast of the activations (free VPU filler under the MXU).
    xb = x_ref[...].astype(wq_ref.dtype)
    q_ref[...] = (jnp.dot(xb, wq_ref[...], preferred_element_type=jnp.float32)
                  + bq_ref[...]).astype(q_ref.dtype)
    k_ref[...] = (jnp.dot(xb, wk_ref[...], preferred_element_type=jnp.float32)
                  + bk_ref[...]).astype(k_ref.dtype)
    v_ref[...] = (jnp.dot(xb, wv_ref[...], preferred_element_type=jnp.float32)
                  + bv_ref[...]).astype(v_ref.dtype)


# ---------------------------------------------------------------------------
# Pass 2: flash attention (online softmax over KV tiles) + output projection.
# grid = (B, N_pad // TQ, N_pad // TK), KV axis last and "arbitrary".
# ---------------------------------------------------------------------------
def _flash_attn_proj_kernel(q_ref, k_ref, v_ref, wproj_ref, bproj_ref, o_ref,
                            m_ref, l_ref, acc_ref, *, seq_len, block_k,
                            mask_tail):
    ki = pl.program_id(2)

    @pl.when(ki == 0)
    def _():
        m_ref[...] = jnp.full(m_ref.shape, -jnp.inf, dtype=m_ref.dtype)
        l_ref[...] = jnp.zeros(l_ref.shape, dtype=l_ref.dtype)
        acc_ref[...] = jnp.zeros(acc_ref.shape, dtype=acc_ref.dtype)

    # Scores (TQ, TK): bf16 operands -> f32 accumulation on the MXU.  The
    # softmax scale is already folded into the Q projection weights.
    s = lax.dot_general(q_ref[...], k_ref[...], (((1,), (1,)), ((), ())),
                        preferred_element_type=jnp.float32)
    if mask_tail:
        col = ki * block_k + lax.broadcasted_iota(jnp.int32, s.shape, 1)
        s = jnp.where(col < seq_len, s, -jnp.inf)

    # Online softmax (exact, max-subtracted); exp/softmax math stays in f32.
    m_prev = m_ref[...]
    m_new = jnp.maximum(m_prev, jnp.max(s, axis=-1, keepdims=True))
    alpha = jnp.exp(m_prev - m_new)
    p = jnp.exp(s - m_new)
    l_ref[...] = alpha * l_ref[...] + jnp.sum(p, axis=-1, keepdims=True)
    acc_ref[...] = alpha * acc_ref[...] + jnp.dot(
        p.astype(v_ref.dtype), v_ref[...], preferred_element_type=jnp.float32)
    m_ref[...] = m_new

    @pl.when(ki == pl.num_programs(2) - 1)
    def _():
        # Normalize with the EUP approximate reciprocal, then fused out-proj.
        out = acc_ref[...] * pl.reciprocal(l_ref[...], approx=True)
        y = jnp.dot(out.astype(wproj_ref.dtype), wproj_ref[...],
                    preferred_element_type=jnp.float32) + bproj_ref[...]
        o_ref[...] = y.astype(o_ref.dtype)
        # TODO(synk): attn_drop / proj_drop are identity in eval mode; no dropout.


def multi_head_attention(x, params, *, num_heads):
    B, N, C = x.shape
    assert C % num_heads == 0
    # Reference RoPE broadcasting is only valid for a single head (see header);
    # in that configuration RoPE is the identity and is elided.
    assert num_heads == 1, "reference module only runs correctly with num_heads == 1"
    head_dim = C // num_heads
    scale = float(head_dim) ** -0.5

    bf16 = jnp.bfloat16
    wqkv = params["wqkv"]                                 # (C, 3C)
    bqkv = params["bqkv"]                                 # (3C,)
    # Fold the softmax scale into the Q projection (one-time op on tiny weights).
    wq = (wqkv[:, 0 * C:1 * C] * scale).astype(bf16)
    wk = wqkv[:, 1 * C:2 * C].astype(bf16)
    wv = wqkv[:, 2 * C:3 * C].astype(bf16)
    bq = (bqkv[0 * C:1 * C] * scale).reshape(1, C).astype(jnp.float32)
    bk = bqkv[1 * C:2 * C].reshape(1, C).astype(jnp.float32)
    bv = bqkv[2 * C:3 * C].reshape(1, C).astype(jnp.float32)
    wproj = params["wproj"].astype(bf16)                  # (C, C)
    bproj = params["bproj"].reshape(1, C).astype(jnp.float32)

    n_pad, tq, tk = _attn_tiles(N, B)
    tn = tq
    mask_tail = n_pad != N
    x_p = x if not mask_tail else jnp.pad(x, ((0, 0), (0, n_pad - N), (0, 0)))

    const_buf = dict(pipeline_mode=pl.Buffered(1))        # single-buffer weights

    # ---------------- pass 1: QKV projection ----------------
    qkv_cost = pl.CostEstimate(
        flops=2 * B * n_pad * C * 3 * C,
        transcendentals=0,
        bytes_accessed=B * n_pad * C * 4 + 3 * C * C * 2 + 3 * C * 4
                       + 3 * B * n_pad * C * 2)

    q, k, v = pl.pallas_call(
        _qkv_proj_kernel,
        out_shape=(jax.ShapeDtypeStruct((B, n_pad, C), bf16),) * 3,
        grid_spec=pltpu.PrefetchScalarGridSpec(
            num_scalar_prefetch=0,
            grid=(B, n_pad // tn),
            in_specs=[
                pl.BlockSpec((None, tn, C), lambda b, n: (b, n, 0)),  # x (f32)
                pl.BlockSpec((C, C), lambda b, n: (0, 0), **const_buf),   # Wq
                pl.BlockSpec((C, C), lambda b, n: (0, 0), **const_buf),   # Wk
                pl.BlockSpec((C, C), lambda b, n: (0, 0), **const_buf),   # Wv
                pl.BlockSpec((1, C), lambda b, n: (0, 0), **const_buf),   # bq
                pl.BlockSpec((1, C), lambda b, n: (0, 0), **const_buf),   # bk
                pl.BlockSpec((1, C), lambda b, n: (0, 0), **const_buf),   # bv
            ],
            out_specs=[
                pl.BlockSpec((None, tn, C), lambda b, n: (b, n, 0)),
                pl.BlockSpec((None, tn, C), lambda b, n: (b, n, 0)),
                pl.BlockSpec((None, tn, C), lambda b, n: (b, n, 0)),
            ],
        ),
        compiler_params=pltpu.CompilerParams(
            dimension_semantics=("parallel", "parallel"),
            vmem_limit_bytes=_VMEM_LIMIT),
        cost_estimate=qkv_cost,
    )(x_p, wq, wk, wv, bq, bk, bv)

    # -------- pass 2: flash attention + output projection --------
    attn_cost = pl.CostEstimate(
        flops=4 * B * n_pad * n_pad * C + 2 * B * n_pad * C * C,
        transcendentals=B * n_pad * n_pad,
        bytes_accessed=(B * n_pad * C * 2
                        + 2 * B * n_pad * (n_pad // tq) * C * 2   # K/V re-streamed per Q tile
                        + C * C * 2 + C * 4
                        + B * n_pad * C * x.dtype.itemsize))

    out = pl.pallas_call(
        functools.partial(_flash_attn_proj_kernel, seq_len=N, block_k=tk,
                          mask_tail=mask_tail),
        out_shape=jax.ShapeDtypeStruct((B, n_pad, C), x.dtype),
        grid_spec=pltpu.PrefetchScalarGridSpec(
            num_scalar_prefetch=0,
            grid=(B, n_pad // tq, n_pad // tk),
            in_specs=[
                pl.BlockSpec((None, tq, C), lambda b, qi, ki: (b, qi, 0)),  # q
                pl.BlockSpec((None, tk, C), lambda b, qi, ki: (b, ki, 0)),  # k
                pl.BlockSpec((None, tk, C), lambda b, qi, ki: (b, ki, 0)),  # v
                pl.BlockSpec((C, C), lambda b, qi, ki: (0, 0), **const_buf),  # W_proj
                pl.BlockSpec((1, C), lambda b, qi, ki: (0, 0), **const_buf),  # b_proj
            ],
            out_specs=pl.BlockSpec((None, tq, C), lambda b, qi, ki: (b, qi, 0)),
            scratch_shapes=[
                pltpu.VMEM((tq, 1), jnp.float32),   # running row max m
                pltpu.VMEM((tq, 1), jnp.float32),   # running row sum l
                pltpu.VMEM((tq, C), jnp.float32),   # output accumulator
            ],
        ),
        compiler_params=pltpu.CompilerParams(
            dimension_semantics=("parallel", "parallel", "arbitrary"),
            vmem_limit_bytes=_VMEM_LIMIT),
        cost_estimate=attn_cost,
    )(q, k, v, wproj, bproj)

    if mask_tail:
        out = out[:, :N, :]
    return out


def _reference(x, params, *, num_heads):
    """Pure-JAX f32 mirror of the PyTorch forward (eval mode)."""
    B, N, C = x.shape
    head_dim = C // num_heads
    qkv = x @ params["wqkv"] + params["bqkv"]                       # (B, N, 3C)
    qkv = qkv.reshape(B, N, 3, num_heads, head_dim).transpose(2, 0, 3, 1, 4)
    q, k, v = qkv[0], qkv[1], qkv[2]                                # (B, H, N, hd)

    half = C // 2
    inv_freq = 1.0 / (10000.0 ** (jnp.arange(half, dtype=jnp.float32) / half))
    pos = jnp.arange(q.shape[1], dtype=jnp.float32)                 # head axis!
    sinusoid = pos[:, None] * inv_freq[None, :]
    cos, sin = jnp.cos(sinusoid), jnp.sin(sinusoid)

    def rope(t):
        t1, t2 = t[..., :half], t[..., half:]
        return jnp.concatenate([t1 * cos - t2 * sin, t1 * sin + t2 * cos], axis=-1)

    q, k = rope(q), rope(k)
    scale = float(head_dim) ** -0.5
    attn = jnp.einsum("bhqd,bhkd->bhqk", q, k) * scale
    attn = jax.nn.softmax(attn, axis=-1)
    out = jnp.einsum("bhqk,bhkd->bhqd", attn, v)
    out = out.transpose(0, 2, 1, 3).reshape(B, N, C)
    return out @ params["wproj"] + params["bproj"]


if __name__ == "__main__":
    B, N, C, H = 2, 16, 32, 1       # batch, seq, embed_dim, num_heads

    key = jax.random.PRNGKey(0)
    kx, k1, k2, k3, k4 = jax.random.split(key, 5)
    x = jax.random.normal(kx, (B, N, C), dtype=jnp.float32)
    params = {
        "wqkv": jax.random.normal(k1, (C, 3 * C), dtype=jnp.float32) * 0.02,
        "bqkv": jax.random.normal(k2, (3 * C,), dtype=jnp.float32) * 0.02,
        "wproj": jax.random.normal(k3, (C, C), dtype=jnp.float32) * 0.02,
        "bproj": jax.random.normal(k4, (C,), dtype=jnp.float32) * 0.02,
    }

    out = multi_head_attention(x, params, num_heads=H)
    jax.block_until_ready(out)

    ref = _reference(x, params, num_heads=H)
    assert out.shape == (B, N, C)
    err = float(jnp.max(jnp.abs(out - ref)))
    # bf16 MXU operands (f32 accumulation) vs a pure-f32 reference.
    assert err < 5e-3, err
    print("KERNEL_OK")
</pallas_src>

<mosaic_0001>
module attributes {stable_mosaic.version = 11 : i64} {
  func.func @_qkv_proj_kernel(%arg0: i32, %arg1: i32, %arg2: memref<1x16x32xf32, #tpu.memory_space<vmem>>, %arg3: memref<32x32xbf16, #tpu.memory_space<vmem>>, %arg4: memref<32x32xbf16, #tpu.memory_space<vmem>>, %arg5: memref<32x32xbf16, #tpu.memory_space<vmem>>, %arg6: memref<1x32xf32, #tpu.memory_space<vmem>>, %arg7: memref<1x32xf32, #tpu.memory_space<vmem>>, %arg8: memref<1x32xf32, #tpu.memory_space<vmem>>, %arg9: memref<1x16x32xbf16, #tpu.memory_space<vmem>>, %arg10: memref<1x16x32xbf16, #tpu.memory_space<vmem>>, %arg11: memref<1x16x32xbf16, #tpu.memory_space<vmem>>) attributes {dimension_semantics = [#tpu.dimension_semantics<parallel>, #tpu.dimension_semantics<parallel>], iteration_bounds = array<i64: 2, 1>, scalar_prefetch = 0 : i64, scratch_operands = 0 : i64, tpu.core_type = #tpu.core_type<tc>, window_params = [{transform_indices = @transform_0, window_bounds = array<i64: 1, 16, 32>}, {pipeline_mode = #tpu.pipeline_mode<synchronous>, transform_indices = @transform_1, window_bounds = array<i64: 32, 32>}, {pipeline_mode = #tpu.pipeline_mode<synchronous>, transform_indices = @transform_2, window_bounds = array<i64: 32, 32>}, {pipeline_mode = #tpu.pipeline_mode<synchronous>, transform_indices = @transform_3, window_bounds = array<i64: 32, 32>}, {pipeline_mode = #tpu.pipeline_mode<synchronous>, transform_indices = @transform_4, window_bounds = array<i64: 1, 32>}, {pipeline_mode = #tpu.pipeline_mode<synchronous>, transform_indices = @transform_5, window_bounds = array<i64: 1, 32>}, {pipeline_mode = #tpu.pipeline_mode<synchronous>, transform_indices = @transform_6, window_bounds = array<i64: 1, 32>}, {transform_indices = @transform_7, window_bounds = array<i64: 1, 16, 32>}, {transform_indices = @transform_8, window_bounds = array<i64: 1, 16, 32>}, {transform_indices = @transform_9, window_bounds = array<i64: 1, 16, 32>}]} {
    %c0 = arith.constant 0 : index
    %c0_0 = arith.constant 0 : index
    %c0_1 = arith.constant 0 : index
    %0 = vector.load %arg2[%c0, %c0_0, %c0_1] : memref<1x16x32xf32, #tpu.memory_space<vmem>>, vector<1x16x32xf32>
    %1 = vector.shape_cast %0 : vector<1x16x32xf32> to vector<16x32xf32>
    %2 = arith.truncf %1 : vector<16x32xf32> to vector<16x32xbf16>
    %c0_2 = arith.constant 0 : index
    %c0_3 = arith.constant 0 : index
    %3 = vector.load %arg3[%c0_2, %c0_3] : memref<32x32xbf16, #tpu.memory_space<vmem>>, vector<32x32xbf16>
    %cst = arith.constant dense<0.000000e+00> : vector<16x32xf32>
    %4 = tpu.matmul %2, %3, %cst {dimension_numbers = #tpu.dot_dimension_numbers<[1], [0], [0], [1], [0, 0, 1, 1], [], []>} : vector<16x32xbf16>, vector<32x32xbf16>, vector<16x32xf32> -> vector<16x32xf32>
    %c0_4 = arith.constant 0 : index
    %c0_5 = arith.constant 0 : index
    %5 = vector.load %arg6[%c0_4, %c0_5] : memref<1x32xf32, #tpu.memory_space<vmem>>, vector<1x32xf32>
    %6 = vector.broadcast %5 : vector<1x32xf32> to vector<16x32xf32>
    %7 = arith.addf %4, %6 : vector<16x32xf32>
    %8 = arith.truncf %7 : vector<16x32xf32> to vector<16x32xbf16>
    %c0_6 = arith.constant 0 : index
    %c0_7 = arith.constant 0 : index
    %c0_8 = arith.constant 0 : index
    %9 = vector.load %arg9[%c0_6, %c0_7, %c0_8] : memref<1x16x32xbf16, #tpu.memory_space<vmem>>, vector<1x16x32xbf16>
    %10 = vector.shape_cast %9 : vector<1x16x32xbf16> to vector<16x32xbf16>
    %11 = vector.shape_cast %8 : vector<16x32xbf16> to vector<1x16x32xbf16>
    tpu.vector_store %arg9[%c0_6, %c0_7, %c0_8], %11 {strides = array<i32>} : memref<1x16x32xbf16, #tpu.memory_space<vmem>>, vector<1x16x32xbf16>,
    %c0_9 = arith.constant 0 : index
    %c0_10 = arith.constant 0 : index
    %12 = vector.load %arg4[%c0_9, %c0_10] : memref<32x32xbf16, #tpu.memory_space<vmem>>, vector<32x32xbf16>
    %cst_11 = arith.constant dense<0.000000e+00> : vector<16x32xf32>
    %13 = tpu.matmul %2, %12, %cst_11 {dimension_numbers = #tpu.dot_dimension_numbers<[1], [0], [0], [1], [0, 0, 1, 1], [], []>} : vector<16x32xbf16>, vector<32x32xbf16>, vector<16x32xf32> -> vector<16x32xf32>
    %c0_12 = arith.constant 0 : index
    %c0_13 = arith.constant 0 : index
    %14 = vector.load %arg7[%c0_12, %c0_13] : memref<1x32xf32, #tpu.memory_space<vmem>>, vector<1x32xf32>
    %15 = vector.broadcast %14 : vector<1x32xf32> to vector<16x32xf32>
    %16 = arith.addf %13, %15 : vector<16x32xf32>
    %17 = arith.truncf %16 : vector<16x32xf32> to vector<16x32xbf16>
    %c0_14 = arith.constant 0 : index
    %c0_15 = arith.constant 0 : index
    %c0_16 = arith.constant 0 : index
    %18 = vector.load %arg10[%c0_14, %c0_15, %c0_16] : memref<1x16x32xbf16, #tpu.memory_space<vmem>>, vector<1x16x32xbf16>
    %19 = vector.shape_cast %18 : vector<1x16x32xbf16> to vector<16x32xbf16>
    %20 = vector.shape_cast %17 : vector<16x32xbf16> to vector<1x16x32xbf16>
    tpu.vector_store %arg10[%c0_14, %c0_15, %c0_16], %20 {strides = array<i32>} : memref<1x16x32xbf16, #tpu.memory_space<vmem>>, vector<1x16x32xbf16>,
    %c0_17 = arith.constant 0 : index
    %c0_18 = arith.constant 0 : index
    %21 = vector.load %arg5[%c0_17, %c0_18] : memref<32x32xbf16, #tpu.memory_space<vmem>>, vector<32x32xbf16>
    %cst_19 = arith.constant dense<0.000000e+00> : vector<16x32xf32>
    %22 = tpu.matmul %2, %21, %cst_19 {dimension_numbers = #tpu.dot_dimension_numbers<[1], [0], [0], [1], [0, 0, 1, 1], [], []>} : vector<16x32xbf16>, vector<32x32xbf16>, vector<16x32xf32> -> vector<16x32xf32>
    %c0_20 = arith.constant 0 : index
    %c0_21 = arith.constant 0 : index
    %23 = vector.load %arg8[%c0_20, %c0_21] : memref<1x32xf32, #tpu.memory_space<vmem>>, vector<1x32xf32>
    %24 = vector.broadcast %23 : vector<1x32xf32> to vector<16x32xf32>
    %25 = arith.addf %22, %24 : vector<16x32xf32>
    %26 = arith.truncf %25 : vector<16x32xf32> to vector<16x32xbf16>
    %c0_22 = arith.constant 0 : index
    %c0_23 = arith.constant 0 : index
    %c0_24 = arith.constant 0 : index
    %27 = vector.load %arg11[%c0_22, %c0_23, %c0_24] : memref<1x16x32xbf16, #tpu.memory_space<vmem>>, vector<1x16x32xbf16>
    %28 = vector.shape_cast %27 : vector<1x16x32xbf16> to vector<16x32xbf16>
    %29 = vector.shape_cast %26 : vector<16x32xbf16> to vector<1x16x32xbf16>
    tpu.vector_store %arg11[%c0_22, %c0_23, %c0_24], %29 {strides = array<i32>} : memref<1x16x32xbf16, #tpu.memory_space<vmem>>, vector<1x16x32xbf16>,
    return
  }
  func.func @transform_0(%arg0: i32, %arg1: i32) -> (i32, i32, i32) {
    %c0_i32 = arith.constant 0 : i32
    %c0_i32_0 = arith.constant 0 : i32
    return %arg0, %arg1, %c0_i32 : i32, i32, i32
  }
  func.func @transform_1(%arg0: i32, %arg1: i32) -> (i32, i32) {
    %c0_i32 = arith.constant 0 : i32
    %c0_i32_0 = arith.constant 0 : i32
    %c0_i32_1 = arith.constant 0 : i32
    return %c0_i32, %c0_i32_0 : i32, i32
  }
  func.func @transform_2(%arg0: i32, %arg1: i32) -> (i32, i32) {
    %c0_i32 = arith.constant 0 : i32
    %c0_i32_0 = arith.constant 0 : i32
    %c0_i32_1 = arith.constant 0 : i32
    return %c0_i32, %c0_i32_0 : i32, i32
  }
  func.func @transform_3(%arg0: i32, %arg1: i32) -> (i32, i32) {
    %c0_i32 = arith.constant 0 : i32
    %c0_i32_0 = arith.constant 0 : i32
    %c0_i32_1 = arith.constant 0 : i32
    return %c0_i32, %c0_i32_0 : i32, i32
  }
  func.func @transform_4(%arg0: i32, %arg1: i32) -> (i32, i32) {
    %c0_i32 = arith.constant 0 : i32
    %c0_i32_0 = arith.constant 0 : i32
    %c0_i32_1 = arith.constant 0 : i32
    return %c0_i32, %c0_i32_0 : i32, i32
  }
  func.func @transform_5(%arg0: i32, %arg1: i32) -> (i32, i32) {
    %c0_i32 = arith.constant 0 : i32
    %c0_i32_0 = arith.constant 0 : i32
    %c0_i32_1 = arith.constant 0 : i32
    return %c0_i32, %c0_i32_0 : i32, i32
  }
  func.func @transform_6(%arg0: i32, %arg1: i32) -> (i32, i32) {
    %c0_i32 = arith.constant 0 : i32
    %c0_i32_0 = arith.constant 0 : i32
    %c0_i32_1 = arith.constant 0 : i32
    return %c0_i32, %c0_i32_0 : i32, i32
  }
  func.func @transform_7(%arg0: i32, %arg1: i32) -> (i32, i32, i32) {
    %c0_i32 = arith.constant 0 : i32
    %c0_i32_0 = arith.constant 0 : i32
    return %arg0, %arg1, %c0_i32 : i32, i32, i32
  }
  func.func @transform_8(%arg0: i32, %arg1: i32) -> (i32, i32, i32) {
    %c0_i32 = arith.constant 0 : i32
    %c0_i32_0 = arith.constant 0 : i32
    return %arg0, %arg1, %c0_i32 : i32, i32, i32
  }
  func.func @transform_9(%arg0: i32, %arg1: i32) -> (i32, i32, i32) {
    %c0_i32 = arith.constant 0 : i32
    %c0_i32_0 = arith.constant 0 : i32
    return %arg0, %arg1, %c0_i32 : i32, i32, i32
  }
}

</mosaic_0001>

<bundles_post_ra>
// kernel: tpu_custom_call.1
= control target key start
LH: loop header
LB: loop body
LE: loop exit
PB: predicated region body
PF: predicated region fallthrough
CT: control target
= control target key end

     0   :  { %s2102_s0 = inlined_call_operand.hbm [shape: f32[2,16,32], index: 0, kind: input, shape index: {}]   ;;  %s2103_s1 = inlined_call_operand.hbm [shape: bf16[32,32], index: 1, kind: input, shape index: {}]   ;;  %s2104_s2 = inlined_call_operand.hbm [shape: bf16[32,32], index: 2, kind: input, shape index: {}]   ;;  %s2105_s3 = inlined_call_operand.hbm [shape: bf16[32,32], index: 3, kind: input, shape index: {}]   ;;  %s2106_s4 = inlined_call_operand.hbm [shape: f32[1,32], index: 4, kind: input, shape index: {}]   ;;  %s2107_s5 = inlined_call_operand.hbm [shape: f32[1,32], index: 5, kind: input, shape index: {}]   ;;  %s2108_s6 = inlined_call_operand.hbm [shape: f32[1,32], index: 6, kind: input, shape index: {}]   ;;  %s2109_s7 = inlined_call_operand.hbm [shape: bf16[2,16,32], index: 7, kind: output, shape index: {0}]   ;;  %s2110_s8 = inlined_call_operand.hbm [shape: bf16[2,16,32], index: 8, kind: output, shape index: {1}]   ;;  %s2111_s9 = inlined_call_operand.hbm [shape: bf16[2,16,32], index: 9, kind: output, shape index: {2}]  }
   0x1   :  { %2120 = sst [smem:[#allocation24_spill]] %s2102_s0 }
   0x2   :  { %2121 = sst [smem:[#allocation25_spill]] %s2103_s1 }
   0x3   :  { %2122 = sst [smem:[#allocation26_spill]] %s2104_s2 }
   0x4   :  { %2123 = sst [smem:[#allocation27_spill]] %s2105_s3 }
   0x5   :  { %2124 = sst [smem:[#allocation28_spill]] %s2109_s7 }
   0x6   :  { %2125 = sst [smem:[#allocation29_spill]] %s2110_s8 }
   0x7   :  { %2126 = sst [smem:[#allocation30_spill]] %s2111_s9 }
   0x8   :  { %15 = vsyncpa [#allocation3], 0 }
   0x9   :  { %17 = vsyncpa [#allocation3 + $0x1], 0 }
   0xa   :  { %18 = vsyncpa [#allocation6], 0 }
   0xb   :  { %19 = vsyncpa [#allocation9], 0 }
   0xc   :  { %20 = vsyncpa [#allocation12], 0 }
   0xd   :  { %21 = vsyncpa [#allocation4], 0 }
   0xe   :  { %23 = vsyncpa [#allocation4 + $0x1], 0 }
   0xf   :  { %24 = vsyncpa [#allocation16], 0 }
  0x10   :  { %26 = vsyncpa [#allocation16 + $0x1], 0  ;;  %s1645_s30 = smov 0   ;;  %s1647_s10 = smov 0  }
  0x11   :  { %s1649_s11 = smov 0   ;;  %s1651_s12 = smov 0  }
  0x12   :  { %s1653_s13 = smov 0   ;;  %s1655_s14 = smov 0  }
  0x13 LB: > { %s1676_s15 = sadd.s32 4294967295, %s1575_s14   ;;  %p982_p0 = scmp.ge.s32.totalorder %s1575_s14, 1  ;;  %s1575_s14 = sphi %s1655_s14, %s32_s14   ;;  %s1571_s13 = sphi %s1653_s13, %s2161_s13   ;;  %s1567_s12 = sphi %s1651_s12, %s2160_s12   ;;  %s1563_s11 = sphi %s1649_s11, %s2159_s11   ;;  %s1559_s10 = sphi %s1647_s10, %s2158_s10   ;;  %s1555_s30 = sphi %s1645_s30, %s2157_s30  }
  0x14   : > { %p2115_p1 = scmp.eq.s32.totalorder %s1676_s15, 0  ;;  %p287_p2 = scmp.lt.s32.totalorder %s1575_s14, 3 }
  0x15   : > { %s1577_s17 = smov [#allocation5]   ;;  %s1578_s20 = smov [#allocation8]  }
  0x16   : > { %p1681_p3 = pnand %p982_p0, %p287_p2  ;;  %s299_s18 = sshll.u32 %s1577_s17, 4  ;;  %s1685_s18 = int_to_ptr.vmem [resolvable:$true] %s299_s18 }
  0x17   : > { %s325_s21 = sshll.u32 %s1578_s20, 4  ;;  %s1579_s22 = smov [#allocation11]   ;;  %s1696_s21 = int_to_ptr.vmem [resolvable:$true] %s325_s21 }
  0x18   : > { %s2127_s16 = scalar_select %p1681_p3, 1, 0 }
  0x19   : > { %p1108_p4 = pneg %p1681_p3  ;;  %s1698_s23 = sshll.u32 %s1579_s22, 4  ;;  %s351_s23 = int_to_ptr.vmem [resolvable:$true] %s1698_s23 }
  0x1a   : > { %s2129_s1 = sld [smem:[#allocation25_spill]] }
  0x1b   : > { %p1692_p6 = pnand %p1108_p4, %p2115_p1 }
  0x1d   : > { %p1708_p8 = pneg %p1692_p6 }
  0x20   : > { %s1223_s26 = scalar_lea.hbm %s2129_s1, 256 }
  0x21   : > { %p1224_p7 = scmp.ne.s32.totalorder %s2129_s1, %s1223_s26  ;;  %p1230_p11 = scmp.lt.u32.totalorder %s1223_s26, %s2129_s1 }
  0x23   : > { %p1226_p9 = pnand %p1708_p8, %p1224_p7 }
  0x25   : > { %p1227_p10 = pneg %p1226_p9 }
  0x27   : > { %p1232_p12 = pnand %p1230_p11, %p1227_p10 }
  0x29   : > { %1235 = shalt.err (!%p1232_p12)
}
  0x2a   : > { %s1236_s22 = scalar_lea.vmem %s1685_s18, 256  ;;  %p1244_p4 = scmp.lt.s32.totalorder %s1685_s18, %s1685_s18 }
  0x2b   : > { %p1237_p13 = scmp.ne.s32.totalorder %s1685_s18, %s1236_s22  ;;  %p1245_p5 = scmp.lt.s32.totalorder %s1236_s22, %s1236_s22 }
  0x2d   : > { %p1239_p0 = pnand %p1237_p13, %p1708_p8  ;;  %p1246_p7 = por %p1245_p5, %p1244_p4 }
  0x2f   : > { %p1240_p2 = pneg %p1239_p0 }
  0x31   : > { %p1247_p9 = pnand %p1246_p7, %p1240_p2 }
  0x33   : > { %1250 = shalt.err (!%p1247_p9)
}
  0x34   : > { %s2117_s24 = smov 64   ;;  %s1581_s25 = smov 4  }
  0x35   : > { %1111 = dma.hbm_to_vmem [thread:$0]  (!%p1692_p6), %s2129_s1, 256, %s1685_s18, [#allocation6], %s2117_s24, %s2117_s24, %s1581_s25  }
  0x36   : > { %s2131_s3 = sld [smem:[#allocation27_spill]] }
  0x3c   : > { %s1251_s20 = scalar_lea.hbm %s2131_s3, 256 }
  0x3d   : > { %p1252_p5 = scmp.ne.s32.totalorder %s2131_s3, %s1251_s20  ;;  %p1258_p12 = scmp.lt.u32.totalorder %s1251_s20, %s2131_s3 }
  0x3f   : > { %p1254_p10 = pnand %p1252_p5, %p1708_p8 }
  0x41   : > { %p1255_p11 = pneg %p1254_p10 }
  0x43   : > { %p1260_p13 = pnand %p1258_p12, %p1255_p11 }
  0x45   : > { %1263 = shalt.err (!%p1260_p13)
}
  0x46   : > { %s1264_s18 = scalar_lea.vmem %s1696_s21, 256  ;;  %p1272_p7 = scmp.lt.s32.totalorder %s1696_s21, %s1696_s21 }
  0x47   : > { %p1265_p0 = scmp.ne.s32.totalorder %s1696_s21, %s1264_s18  ;;  %p1273_p9 = scmp.lt.s32.totalorder %s1264_s18, %s1264_s18 }
  0x49   : > { %p1267_p2 = pnand %p1265_p0, %p1708_p8  ;;  %p1274_p5 = por %p1273_p9, %p1272_p7 }
  0x4b   : > { %p1268_p4 = pneg %p1267_p2 }
  0x4d   : > { %p1275_p10 = pnand %p1274_p5, %p1268_p4 }
  0x4f   : > { %1278 = shalt.err (!%p1275_p10)
}
  0x50   : > { %1117 = dma.hbm_to_vmem [thread:$0]  (!%p1692_p6), %s2131_s3, 256, %s1696_s21, [#allocation9], %s2117_s24, %s2117_s24, %s1581_s25  }
  0x51   : > { %s1279_s27 = scalar_lea.hbm %s2107_s5, 16 }
  0x52   : > { %p1280_p11 = scmp.ne.s32.totalorder %s2107_s5, %s1279_s27  ;;  %p1286_p0 = scmp.lt.u32.totalorder %s1279_s27, %s2107_s5 }
  0x54   : > { %p1282_p12 = pnand %p1280_p11, %p1708_p8 }
  0x56   : > { %p1283_p13 = pneg %p1282_p12 }
  0x58   : > { %p1288_p2 = pnand %p1286_p0, %p1283_p13 }
  0x5a   : > { %1291 = shalt.err (!%p1288_p2)
}
  0x5b   : > { %s1292_s18 = scalar_lea.vmem %s351_s23, 16  ;;  %s1299_s21 = scalar_lea.vmem %s351_s23, 32 }
  0x5c   : > { %p1293_p4 = scmp.ne.s32.totalorder %s351_s23, %s1292_s18  ;;  %p1300_p5 = scmp.lt.s32.totalorder %s351_s23, %s351_s23 }
  0x5d   : > { %p1301_p10 = scmp.lt.s32.totalorder %s1299_s21, %s1292_s18 }
  0x5e   : > { %p1295_p7 = pnand %p1293_p4, %p1708_p8 }
  0x5f   : > { %p1302_p1 = por %p1301_p10, %p1300_p5 }
  0x60   : > { %p1296_p9 = pneg %p1295_p7 }
  0x62   : > { %p1303_p3 = pnand %p1302_p1, %p1296_p9 }
  0x64   : > { %1306 = shalt.err (!%p1303_p3)
}
  0x65   : > { %1123 = dma.hbm_to_vmem [thread:$0]  (!%p1692_p6), %s2107_s5, 16, %s351_s23, [#allocation12]  }
  0x66   : > { %s1582_s9 = smov [#allocation7]   ;;  %s1583_s27 = smov [#allocation10]  }
  0x67   : > { %s312_s26 = sshll.u32 %s1582_s9, 4  ;;  %s339_s28 = sshll.u32 %s1583_s27, 4  ;;  %s313_s26 = int_to_ptr.vmem [resolvable:$true] %s312_s26  ;;  %s340_s28 = int_to_ptr.vmem [resolvable:$true] %s339_s28 }
  0x68   : > { %s2132_s2 = sld [smem:[#allocation26_spill]] }
  0x6e   : > { %s1307_s22 = scalar_lea.hbm %s2132_s2, 256 }
  0x6f   : > { %p1308_p1 = scmp.ne.s32.totalorder %s2132_s2, %s1307_s22  ;;  %p1314_p12 = scmp.lt.u32.totalorder %s1307_s22, %s2132_s2 }
  0x71   : > { %p1310_p3 = pnand %p1308_p1, %p1708_p8 }
  0x73   : > { %p1311_p11 = pneg %p1310_p3 }
  0x75   : > { %p1316_p13 = pnand %p1314_p12, %p1311_p11 }
  0x77   : > { %1319 = shalt.err (!%p1316_p13)
}
  0x78   : > { %s1320_s23 = scalar_lea.vmem %s313_s26, 256  ;;  %p1328_p7 = scmp.lt.s32.totalorder %s313_s26, %s313_s26 }
  0x79   : > { %p1321_p0 = scmp.ne.s32.totalorder %s313_s26, %s1320_s23  ;;  %p1329_p9 = scmp.lt.s32.totalorder %s1320_s23, %s1320_s23 }
  0x7b   : > { %p1323_p2 = pnand %p1321_p0, %p1708_p8  ;;  %p1330_p5 = por %p1329_p9, %p1328_p7 }
  0x7d   : > { %p1324_p4 = pneg %p1323_p2 }
  0x7f   : > { %p1331_p10 = pnand %p1330_p5, %p1324_p4 }
  0x81   : > { %1334 = shalt.err (!%p1331_p10)
}
  0x82   : > { %s2133_s8 = smov 64   ;;  %s1335_s20 = scalar_lea.hbm %s2106_s4, 16 }
  0x83   : > { %1114 = dma.hbm_to_vmem [thread:$0]  (!%p1692_p6), %s2132_s2, 256, %s313_s26, [#allocation6], %s2133_s8, %s2133_s8, %s1581_s25  }
  0x84   : > { %p1336_p1 = scmp.ne.s32.totalorder %s2106_s4, %s1335_s20  ;;  %p1342_p12 = scmp.lt.u32.totalorder %s1335_s20, %s2106_s4 }
  0x86   : > { %p1338_p3 = pnand %p1336_p1, %p1708_p8 }
  0x88   : > { %p1339_p11 = pneg %p1338_p3 }
  0x8a   : > { %p1344_p13 = pnand %p1342_p12, %p1339_p11 }
  0x8c   : > { %1347 = shalt.err (!%p1344_p13)
}
  0x8d   : > { %s1348_s23 = scalar_lea.vmem %s340_s28, 16  ;;  %s1355_s25 = scalar_lea.vmem %s340_s28, 32 }
  0x8e   : > { %p1349_p0 = scmp.ne.s32.totalorder %s340_s28, %s1348_s23  ;;  %p1356_p7 = scmp.lt.s32.totalorder %s340_s28, %s340_s28 }
  0x8f   : > { %p1357_p9 = scmp.lt.s32.totalorder %s1355_s25, %s1348_s23 }
  0x90   : > { %p1351_p2 = pnand %p1349_p0, %p1708_p8 }
  0x91   : > { %p1358_p5 = por %p1357_p9, %p1356_p7 }
  0x92   : > { %p1352_p4 = pneg %p1351_p2 }
  0x94   : > { %p1359_p10 = pnand %p1358_p5, %p1352_p4 }
  0x96   : > { %1362 = shalt.err (!%p1359_p10)
}
  0x97   : > { %1120 = dma.hbm_to_vmem [thread:$0]  (!%p1692_p6), %s2106_s4, 16, %s340_s28, [#allocation9]  }
  0x98   : > { %s1584_s24 = smov [#allocation13]   ;;  %s1363_s20 = scalar_lea.hbm %s2108_s6, 16 }
  0x99   : > { %s361_s9 = sshll.u32 %s1584_s24, 4  ;;  %p1364_p1 = scmp.ne.s32.totalorder %s2108_s6, %s1363_s20  ;;  %s362_s9 = int_to_ptr.vmem [resolvable:$true] %s361_s9 }
  0x9a   : > { %p1370_p12 = scmp.lt.u32.totalorder %s1363_s20, %s2108_s6 }
  0x9b   : > { %p1366_p3 = pnand %p1364_p1, %p1708_p8 }
  0x9d   : > { %p1367_p11 = pneg %p1366_p3 }
  0x9f   : > { %p1372_p13 = pnand %p1370_p12, %p1367_p11 }
  0xa1   : > { %1375 = shalt.err (!%p1372_p13)
}
  0xa2   : > { %s1376_s28 = scalar_lea.vmem %s362_s9, 16  ;;  %s1383_s23 = scalar_lea.vmem %s362_s9, 32 }
  0xa3   : > { %p1377_p0 = scmp.ne.s32.totalorder %s362_s9, %s1376_s28  ;;  %p1384_p7 = scmp.lt.s32.totalorder %s362_s9, %s362_s9 }
  0xa4   : > { %p1385_p9 = scmp.lt.s32.totalorder %s1383_s23, %s1376_s28 }
  0xa5   : > { %p1379_p2 = pnand %p1377_p0, %p1708_p8 }
  0xa6   : > { %p1386_p5 = por %p1385_p9, %p1384_p7 }
  0xa7   : > { %p1380_p4 = pneg %p1379_p2 }
  0xa9   : > { %p1387_p10 = pnand %p1386_p5, %p1380_p4 }
  0xab   : > { %1390 = shalt.err (!%p1387_p10)
}
  0xac   : > { %1126 = dma.hbm_to_vmem [thread:$0]  (!%p1692_p6), %s2108_s6, 16, %s362_s9, [#allocation12]  }
  0xad   : > { %s2118_s29 = sadd.s32 4294967294, %s1575_s14   ;;  %s44_s8 = sadd.s32 1, %s1571_s13 }
  0xae   : > { %p46_p8 = scmp.ge.s32.totalorder %s44_s8, 2  ;;  %s53_s19 = sadd.s32 1, %s1563_s11 }
  0xaf   : > { %p60_p1 = scmp.ne.s32.totalorder %s1563_s11, %s1559_s10  ;;  %p61_p3 = scmp.eq.s32.totalorder %s1575_s14, 0 }
  0xb0   : > { %s2163_s8 = smov (%p46_p8, %s44_s8), 0  ;;  %p66_p12 = scmp.ne.s32.totalorder %s1559_s10, %s1555_s30 }
  0xb1   : > { %p1842_p11 = por %p61_p3, %p60_p1  ;;  %s48_s9 = ssub.s32 %s1571_s13, %s2163_s8 }
  0xb2   : > { %p218_p6 = scmp.eq.s32.totalorder %s1676_s15, 1  ;;  %p51_p13 = scmp.eq.s32.totalorder %s48_s9, 0 }
  0xb3   : > { %p2135_p0 = scmp.eq.s32.totalorder %s1676_s15, 0  ;;  %p224_p7 = scmp.eq.s32.totalorder %s2118_s29, 1 }
  0xb4   : > { %p1857_p4 = por %p218_p6, %p60_p1  ;;  %p1147_p5 = scmp.lt.s32.totalorder %s1575_s14, 2 }
  0xb5   : > { %p1853_p2 = por %p2135_p0, %p66_p12  ;;  %p1866_p9 = por %p224_p7, %p66_p12 }
  0xb6   : > { %s2137_s17 = scalar_select %p1857_p4, 1, 0 }
  0xb7   : > { %s1864_s20 = scalar_select %p51_p13, %s1563_s11, %s53_s19  }
  0xb8   : > { %s2138_s22 = scalar_select %p1866_p9, 1, 0 }
  0xb9   : > { %s372_s18 = sand.u32 1, %s1563_s11   ;;  %s1033_s21 = sshll.u32 %s1571_s13, 8 }
  0xba   : > { %s990_s7 = sshll.u32 %s372_s18, 4  ;;  %s2139_s0 = sld [smem:[#allocation24_spill]] }
  0xbb   : > { %s376_s26 = scalar_lea.vmem [#allocation2], %s990_s7  ;;  %p1880_p10 = pnand %p1147_p5, %p1842_p11 }
  0xbc   : > { %s385_s19 = sshll.u32 %s376_s26, 4  ;;  %s1886_s29 = scalar_lea.sflag [#allocation3], %s372_s18  ;;  %s1884_s19 = int_to_ptr.vmem [resolvable:$true] %s385_s19 }
  0xbd   : > { %p1393_p1 = pneg %p1880_p10 }
  0xc0   : > { %s1876_s25 = scalar_lea.hbm %s2139_s0, %s1033_s21  ;;  %s1396_s7 = scalar_lea.hbm %s2139_s0, 512 }
  0xc1   : > { %s1391_s28 = scalar_lea.hbm %s1876_s25, 256  ;;  %p1397_p11 = scmp.lt.u32.totalorder %s1876_s25, %s2139_s0 }
  0xc2   : > { %p1392_p8 = scmp.ne.s32.totalorder %s1876_s25, %s1391_s28  ;;  %p1398_p6 = scmp.lt.u32.totalorder %s1396_s7, %s1391_s28 }
  0xc3   : > { %p1400_p0 = scmp.lt.u32.totalorder %s1391_s28, %s1876_s25 }
  0xc4   : > { %p1394_p3 = pnand %p1393_p1, %p1392_p8  ;;  %p1399_p13 = por %p1398_p6, %p1397_p11 }
  0xc6   : > { %p1395_p12 = pneg %p1394_p3  ;;  %p1401_p7 = por %p1400_p0, %p1399_p13 }
  0xc8   : > { %p1402_p5 = pnand %p1401_p7, %p1395_p12 }
  0xca   : > { %1405 = shalt.err (!%p1402_p5)
}
  0xcb   : > { %s1406_s18 = scalar_lea.vmem %s1884_s19, 256  ;;  %s1585_s21 = smov [#allocation2]  }
  0xcc   : > { %p1407_p8 = scmp.ne.s32.totalorder %s1884_s19, %s1406_s18  ;;  %s1411_s24 = sshll.u32 %s1585_s21, 4  ;;  %s1412_s24 = int_to_ptr.vmem [resolvable:$false] %s1411_s24 }
  0xcd   : > { %s1413_s23 = scalar_lea.vmem %s1412_s24, 512  ;;  %p1414_p4 = scmp.lt.s32.totalorder %s1884_s19, %s1412_s24 }
  0xce   : > { %p1409_p3 = pnand %p1407_p8, %p1393_p1  ;;  %p1415_p11 = scmp.lt.s32.totalorder %s1413_s23, %s1406_s18 }
  0xd0   : > { %p1410_p9 = pneg %p1409_p3  ;;  %p1416_p6 = por %p1415_p11, %p1414_p4 }
  0xd2   : > { %p1417_p13 = pnand %p1416_p6, %p1410_p9 }
  0xd4   : > { %1420 = shalt.err (!%p1417_p13)
}
  0xd5   : > { %s1586_s28 = smov 128   ;;  %s1587_s7 = smov 8  }
  0xd6   : > { %1130 = dma.hbm_to_vmem [thread:$0]  (!%p1880_p10), %s1876_s25, 256, %s1884_s19, %s1886_s29, %s1586_s28, %s1586_s28, %s1587_s7  }
  0xd7   : > { %p2141_p1 = scmp.ne.s32.totalorder %s2127_s16, 0 }
  0xd8   : > { %s1917_s26 = sand.u32 (!%p2141_p1), 1, %s1559_s10  }
  0xd9   : > { %397 = sbr.rel (%p2141_p1) target bundleno = 531 (0x213), region = 48  ;;  %s994_s18 = sshll.u32 (!%p2141_p1), %s1917_s26, 4 }
  0xda   : > { %s400_s21 = scalar_lea.sflag (!%p2141_p1), [#allocation3], %s1917_s26  ;;  %s403_s24 = scalar_lea.vmem (!%p2141_p1), [#allocation2], %s994_s18 }
  0xe0   : > { %1530 = dma.done.wait (%p1853_p2), %s400_s21, 256  }
  0xe1   : > { %1532 = vsyncadd (%p1853_p2), %s400_s21, 4294967040  ;;  %p2142_p4 = scmp.eq.s32.totalorder %s1676_s15, 0 }
  0xe3   : > { %1534 = dma.done.wait (%p2142_p4), [#allocation6], 512   ;;  %p2143_p9 = pmov %p2142_p4 }
  0xe4   : > { %p2144_p10 = pmov %p2142_p4 }
  0xe5   : > { %1536 = vsyncadd (%p2143_p9), [#allocation6], 4294966784 }
  0xe6   : > { %1538 = dma.done.wait (%p2144_p10), [#allocation9], 272   ;;  %p2145_p12 = pmov %p2142_p4 }
  0xe7   : > { %p2146_p0 = pmov %p2142_p4 }
  0xe8   : > { %1540 = vsyncadd (%p2145_p12), [#allocation9], 4294967024 }
  0xe9   : > { %1542 = dma.done.wait (%p2146_p0), [#allocation12], 32   ;;  %p2147_p7 = pmov %p2146_p0 }
  0xea   : > { %v1588_v0 = vmov 0.0   ;;  %vm1589_vm0 = vmmov 0   ;;  %v1217_v1 = vld [vmem:[#allocation5] sm:$0xff]   ;;  %v1218_v2 = vld [vmem:[#allocation5 + $0x8] sm:$0xff]   ;;  %v1219_v3 = vld [vmem:[#allocation7] sm:$0xff]   ;;  %vm503_vm1 = vcmask 261120  }
  0xeb   : > { %1544 = vsyncadd (%p2147_p7), [#allocation12], 4294967264  ;;  %1052 = vmatprep.subr.bf16.mxu0 %v1588_v0  ;;  %1060 = vmatprep.subr.bf16.mxu1 %v1588_v0  ;;  %v477_v4 = vld [vmem:[%s403_s24] sm:$0xff]  ;;  %v478_v5 = vld [vmem:[%s403_s24 + $0x8] sm:$0xff]  ;;  %s1941_s16 = sshll.u32 %s1917_s26, 3  ;;  %vm556_vm2 = vcmask 257024  }
  0xec   : > { %1056 = vmatprep.mubr.msk.bf16.mxu0 %vm1589_vm0, %v1588_v0  ;;  %1064 = vmatprep.mubr.msk.bf16.mxu1 %vm1589_vm0, %v1588_v0  ;;  %v479_v6 = vpack.c.bf16 %v478_v5, %v477_v4  ;;  %v1221_v7 = vld [vmem:[#allocation7 + $0x8] sm:$0xff]   ;;  %v1220_v8 = vld [vmem:[#allocation8] sm:$0xff]   ;;  %v1222_v9 = vld [vmem:[#allocation8 + $0x8] sm:$0xff]   ;;  %s457_s29 = scalar_lea.vmem [#allocation14], %s1941_s16  ;;  %s1945_s25 = scalar_lea.vmem [#allocation15], %s1941_s16 }
  0xed   : > { %1053 = vmatpush3.bf16.msra.mxu0 %v1217_v1  ;;  %1061 = vmatpush3.bf16.msra.mxu1 %v1219_v3  ;;  %v1004_v10 = vld [vmem:[#allocation10] ss:$0 sm:$0xff]  ;;  %v1010_v12 = vld [vmem:[#allocation11] ss:$0 sm:$0xff]  ;;  %s733_s27 = sshll.u32 %s457_s29, 4  ;;  %s751_s19 = sshll.u32 %s1945_s25, 4  ;;  %s1959_s27 = int_to_ptr.vmem [resolvable:$true] %s733_s27  ;;  %s1972_s19 = int_to_ptr.vmem [resolvable:$true] %s751_s19 }
  0xee   : > { %1054 = vmatprep.subr.bf16.mxu0 %v1588_v0  ;;  %1062 = vmatprep.subr.bf16.mxu1 %v1588_v0  ;;  %s1949_s9 = sshll.u32 %s1567_s12, 7  ;;  %s2148_s7 = sld [smem:[#allocation28_spill]]  ;;  %v1961_v27 = vld [vmem:[#allocation13] ss:$0 sm:$0xff] }
  0xef   : > { %s2149_s23 = sld [smem:[#allocation29_spill]]  ;;  %s1421_s28 = scalar_lea.vmem %s1959_s27, 128 }
  0xf0   : > { %p1422_p2 = scmp.ne.s32.totalorder %s1959_s27, %s1421_s28  ;;  %p2150_p5 = scmp.ne.s32.totalorder %s2137_s17, 0 }
  0xf1   : > { %1055 = vmatpush3.bf16.msra.mxu0 %v1218_v2  ;;  %1063 = vmatpush3.bf16.msra.mxu1 %v1221_v7  ;;  %s1590_s1 = smov [#allocation14]  }
  0xf2   : > { %1068 = vmatprep.subr.bf16.mxu0 %v1588_v0  ;;  %p1423_p8 = pnand %p1422_p2, %p2150_p5  ;;  %s1425_s2 = sshll.u32 %s1590_s1, 4  ;;  %s1426_s2 = int_to_ptr.vmem [resolvable:$false] %s1425_s2 }
  0xf3   : > { %p1428_p11 = scmp.lt.s32.totalorder %s1959_s27, %s1426_s2 }
  0xf4   : > { %1057 = vmatmul.mubr.msk.bf16.vlgmr.msra.gmra.mrb[0].mxu0 %vm503_vm1, %v479_v6  ;;  %1065 = vmatmul.mubr.msk.bf16.vlgmr.msra.gmra.mrb[0].mxu1 %vm503_vm1, %v479_v6  ;;  %s1957_s18 = scalar_lea.hbm %s2148_s7, %s1949_s9  ;;  %p1424_p3 = pneg %p1423_p8 }
  0xf5   : > { %1069 = vmatpush3.bf16.msra.mxu0 %v1220_v8  ;;  %1072 = vmatprep.mubr.msk.bf16.mxu0 %vm1589_vm0, %v1588_v0  ;;  %s1970_s0 = scalar_lea.hbm %s2149_s23, %s1949_s9 }
  0xf6   : > { %1070 = vmatprep.subr.bf16.mxu0 %v1588_v0 }
  0xf9   : > { %1071 = vmatpush3.bf16.msra.mxu0 %v1222_v9 }
  0xfc   : > { %1073 = vmatmul.mubr.msk.bf16.vlgmr.msra.gmra.mrb[4].mxu0 %vm503_vm1, %v479_v6 }
 0x1c7   : > { %v541_v11 = vpop.f32.mrb[0].mxu0  ;;  %v616_v16 = vpop.f32.mrb[0].mxu1 }
 0x1c8   : > { %v542_v13 = vadd.f32 %v1004_v10, %v541_v11  ;;  %v1058_v14 = vpop.f32.mrb[1].mxu0  ;;  %v617_v20 = vadd.f32 %v1010_v12, %v616_v16  ;;  %v1066_v21 = vpop.f32.mrb[1].mxu1 }
 0x1c9   : > { %v544_v15 = vpop.f32.mrb[2].mxu0  ;;  %v619_v22 = vpop.f32.mrb[2].mxu1 }
 0x1ca   : > { %v1034_v17 = vpack.c.bf16 %v542_v13, %v542_v13  ;;  %v545_v18 = vadd.f32 %v1004_v10, %v544_v15  ;;  %v1059_v19 = vpop.f32.mrb[3].mxu0  ;;  %v1036_v24 = vpack.c.bf16 %v617_v20, %v617_v20  ;;  %v620_v25 = vadd.f32 %v1010_v12, %v619_v22  ;;  %v1067_v26 = vpop.f32.mrb[3].mxu1 }
 0x1cc   : > { %557 = vst.msk [vmem:[%s457_s29] sm:$0xf] %vm556_vm2, %v1034_v17  ;;  %v1035_v23 = vpack.c.bf16 %v545_v18, %v545_v18  ;;  %631 = vst.msk [vmem:[%s1945_s25] sm:$0xf] %vm556_vm2, %v1036_v24  ;;  %v1037_v28 = vpack.c.bf16 %v620_v25, %v620_v25 }
 0x1ce   : > { %558 = vst.msk [vmem:[%s457_s29 + $0x4] sm:$0xf] %vm556_vm2, %v1035_v23  ;;  %s1427_s29 = scalar_lea.vmem %s1426_s2, 256 }
 0x1cf   : > { %v690_v29 = vpop.f32.mrb[4].mxu0  ;;  %p1429_p6 = scmp.lt.s32.totalorder %s1427_s29, %s1421_s28 }
 0x1d1   : > { %p1430_p13 = por %p1429_p6, %p1428_p11 }
 0x1d3   : > { %p1431_p1 = pnand %p1430_p13, %p1424_p3 }
 0x1d5   : > { %1434 = shalt.err (!%p1431_p1)
}
 0x1d6   : > { %s1435_s21 = scalar_lea.hbm %s1957_s18, 128  ;;  %s1439_s1 = scalar_lea.hbm %s2148_s7, 256 }
 0x1d7   : > { %p1436_p4 = scmp.ne.s32.totalorder %s1957_s18, %s1435_s21  ;;  %p1440_p12 = scmp.lt.u32.totalorder %s1957_s18, %s2148_s7 }
 0x1d8   : > { %p1441_p0 = scmp.lt.u32.totalorder %s1439_s1, %s1435_s21  ;;  %p1443_p2 = scmp.lt.u32.totalorder %s1435_s21, %s1957_s18 }
 0x1d9   : > { %p1437_p9 = pnand %p1436_p4, %p2150_p5 }
 0x1da   : > { %p1442_p7 = por %p1441_p0, %p1440_p12 }
 0x1db   : > { %p1438_p10 = pneg %p1437_p9 }
 0x1dc   : > { %p1444_p8 = por %p1443_p2, %p1442_p7 }
 0x1de   : > { %p1445_p3 = pnand %p1444_p8, %p1438_p10 }
 0x1e0   : > { %1448 = shalt.err (!%p1445_p3)
}
 0x1e1   : > { %s1591_s28 = smov 64   ;;  %s1592_s12 = smov 4   ;;  %632 = vst.msk [vmem:[%s1945_s25 + $0x4] sm:$0xf] %vm556_vm2, %v1037_v28  ;;  %v691_v30 = vadd.f32 %v1961_v27, %v690_v29  ;;  %v1074_v31 = vpop.f32.mrb[5].mxu0 }
 0x1e2   : > { %s2151_s3 = scalar_lea.sflag [#allocation4], %s1917_s26  ;;  %s2005_s29 = scalar_lea.vmem [#allocation17], %s1941_s16  ;;  %v693_v32 = vpop.f32.mrb[6].mxu0 }
 0x1e3   : > { %1102 = dma.vmem_to_hbm [thread:$0]  (%p2150_p5), %s1959_s27, 128, %s1957_s18, %s2151_s3, %s1591_s28, %s1591_s28, %s1592_s12  }
 0x1e4   : > { %s769_s21 = sshll.u32 %s2005_s29, 4  ;;  %s2152_s24 = sand.u32 1, %s1676_s15   ;;  %s2042_s21 = int_to_ptr.vmem [resolvable:$true] %s769_s21 }
 0x1e5   : > { %s2010_s1 = scalar_lea.sflag [#allocation16], %s2152_s24  ;;  %s1449_s2 = scalar_lea.vmem %s1972_s19, 128 }
 0x1e6   : > { %p1450_p11 = scmp.ne.s32.totalorder %s1972_s19, %s1449_s2  ;;  %s1593_s26 = smov [#allocation15]  }
 0x1e7   : > { %s1453_s27 = sshll.u32 %s1593_s26, 4  ;;  %s1454_s27 = int_to_ptr.vmem [resolvable:$false] %s1453_s27 }
 0x1e8   : > { %p1451_p6 = pnand %p1450_p11, %p2150_p5  ;;  %s1455_s25 = scalar_lea.vmem %s1454_s27, 256 }
 0x1e9   : > { %p1456_p1 = scmp.lt.s32.totalorder %s1972_s19, %s1454_s27  ;;  %p1457_p4 = scmp.lt.s32.totalorder %s1455_s25, %s1449_s2 }
 0x1ea   : > { %p1452_p13 = pneg %p1451_p6 }
 0x1eb   : > { %p1458_p9 = por %p1457_p4, %p1456_p1 }
 0x1ed   : > { %p1459_p10 = pnand %p1458_p9, %p1452_p13 }
 0x1ef   : > { %1462 = shalt.err (!%p1459_p10)
}
 0x1f0   : > { %s1463_s15 = scalar_lea.hbm %s1970_s0, 128  ;;  %s1467_s3 = scalar_lea.hbm %s2149_s23, 256 }
 0x1f1   : > { %p1464_p12 = scmp.ne.s32.totalorder %s1970_s0, %s1463_s15  ;;  %p1468_p2 = scmp.lt.u32.totalorder %s1970_s0, %s2149_s23 }
 0x1f2   : > { %p1469_p8 = scmp.lt.u32.totalorder %s1467_s3, %s1463_s15  ;;  %p1471_p11 = scmp.lt.u32.totalorder %s1463_s15, %s1970_s0 }
 0x1f3   : > { %p1465_p0 = pnand %p1464_p12, %p2150_p5 }
 0x1f4   : > { %p1470_p3 = por %p1469_p8, %p1468_p2 }
 0x1f5   : > { %p1466_p7 = pneg %p1465_p0 }
 0x1f6   : > { %p1472_p6 = por %p1471_p11, %p1470_p3 }
 0x1f8   : > { %p1473_p13 = pnand %p1472_p6, %p1466_p7 }
 0x1fa   : > { %1476 = shalt.err (!%p1473_p13)
}
 0x1fb   : > { %1103 = dma.vmem_to_hbm [thread:$0]  (%p2150_p5), %s1972_s19, 128, %s1970_s0, %s2010_s1, %s1591_s28, %s1591_s28, %s1592_s12   ;;  %v1038_v33 = vpack.c.bf16 %v691_v30, %v691_v30  ;;  %v694_v34 = vadd.f32 %v1961_v27, %v693_v32  ;;  %v1075_v35 = vpop.f32.mrb[7].mxu0 }
 0x1fc   : > { %s2153_s25 = sld [smem:[#allocation30_spill]]  ;;  %s1477_s0 = scalar_lea.vmem %s2042_s21, 128 }
 0x1fd   : > { %705 = vst.msk [vmem:[%s2005_s29] sm:$0xf] %vm556_vm2, %v1038_v33  ;;  %v1039_v36 = vpack.c.bf16 %v694_v34, %v694_v34  ;;  %p1478_p1 = scmp.ne.s32.totalorder %s2042_s21, %s1477_s0  ;;  %s1594_s19 = smov [#allocation17]  }
 0x1fe   : > { %s1481_s16 = sshll.u32 %s1594_s19, 4  ;;  %s1482_s16 = int_to_ptr.vmem [resolvable:$false] %s1481_s16 }
 0x1ff   : > { %706 = vst.msk [vmem:[%s2005_s29 + $0x4] sm:$0xf] %vm556_vm2, %v1039_v36  ;;  %p1479_p4 = pnand %p1478_p1, %p2150_p5  ;;  %s1483_s18 = scalar_lea.vmem %s1482_s16, 256 }
 0x200   : > { %p1484_p10 = scmp.lt.s32.totalorder %s2042_s21, %s1482_s16  ;;  %p1485_p12 = scmp.lt.s32.totalorder %s1483_s18, %s1477_s0 }
 0x201   : > { %p1480_p9 = pneg %p1479_p4 }
 0x202   : > { %s2048_s15 = scalar_lea.hbm %s2153_s25, %s1949_s9  ;;  %p1486_p0 = por %p1485_p12, %p1484_p10 }
 0x204   : > { %p1487_p7 = pnand %p1486_p0, %p1480_p9 }
 0x206   : > { %1490 = shalt.err (!%p1487_p7)
}
 0x207   : > { %s1491_s9 = scalar_lea.hbm %s2048_s15, 128  ;;  %s1495_s24 = scalar_lea.hbm %s2153_s25, 256 }
 0x208   : > { %p1492_p2 = scmp.ne.s32.totalorder %s2048_s15, %s1491_s9  ;;  %p1496_p11 = scmp.lt.u32.totalorder %s2048_s15, %s2153_s25 }
 0x209   : > { %p1497_p6 = scmp.lt.u32.totalorder %s1495_s24, %s1491_s9  ;;  %p1499_p1 = scmp.lt.u32.totalorder %s1491_s9, %s2048_s15 }
 0x20a   : > { %p1493_p8 = pnand %p1492_p2, %p2150_p5 }
 0x20b   : > { %p1498_p13 = por %p1497_p6, %p1496_p11 }
 0x20c   : > { %p1494_p3 = pneg %p1493_p8 }
 0x20d   : > { %p1500_p4 = por %p1499_p1, %p1498_p13 }
 0x20f   : > { %p1501_p9 = pnand %p1500_p4, %p1494_p3 }
 0x211   : > { %1504 = shalt.err (!%p1501_p9)
}
 0x212   : > { %1104 = dma.vmem_to_hbm [thread:$0]  (%p2150_p5), %s2042_s21, 128, %s2048_s15, %s2010_s1, %s1591_s28, %s1591_s28, %s1592_s12  }
 0x213 PF: > { %s784_s27 = sand.u32 1, %s1555_s30   ;;  %p2154_p10 = scmp.ne.s32.totalorder %s2138_s22, 0 }
 0x214   : > { %p2155_p12 = scmp.ge.s32.totalorder %s1575_s14, 2  ;;  %s785_s0 = scalar_lea.sflag [#allocation4], %s784_s27 }
 0x216   : > { %p1132_p0 = pnand %p2155_p12, %p2154_p10 }
 0x218   : > { %1546 = dma.done.wait (!%p1132_p0), %s785_s0, 128  }
 0x219   : > { %1548 = vsyncadd (!%p1132_p0), %s785_s0, 4294967168  ;;  %s2156_s17 = sadd.s32 4294967294, %s1575_s14  }
 0x21a   : > { %s793_s19 = sand.u32 1, %s2156_s17  }
 0x21b   : > { %s794_s16 = scalar_lea.sflag [#allocation16], %s793_s19 }
 0x21c   : > { %1550 = dma.done.wait (!%p1132_p0), %s794_s16, 256  }
 0x21d   : > { %1552 = vsyncadd (!%p1132_p0), %s794_s16, 4294967040  ;;  %s32_s14 = sadd.s32 1, %s1575_s14   ;;  %s2157_s30 = smov %s1559_s10 }
 0x21e   : > { %p29_p5 = scmp.ge.s32.totalorder %s32_s14, 4   ;;  %s2158_s10 = smov %s1563_s11 }
 0x21f   : > { %s2159_s11 = smov %s1864_s20  ;;  %s2160_s12 = smov %s1571_s13 }
 0x220   : > { %s2161_s13 = smov %s2163_s8  ;;  %31 = sbr.rel (!%p29_p5) target bundleno = 19 (0x13), region = 149 }
 0x227   :  { %808 = vsyncpa [#allocation3], 1 }
 0x228   :  { %810 = vsyncpa [#allocation3 + $0x1], 1 }
 0x229   :  { %811 = vsyncpa [#allocation6], 1 }
 0x22a   :  { %812 = vsyncpa [#allocation9], 1 }
 0x22b   :  { %813 = vsyncpa [#allocation12], 1 }
 0x22c   :  { %814 = vsyncpa [#allocation4], 1 }
 0x22d   :  { %816 = vsyncpa [#allocation4 + $0x1], 1 }
 0x22e   :  { %817 = vsyncpa [#allocation16], 1 }
 0x22f   :  { %819 = vsyncpa [#allocation16 + $0x1], 1 }

</bundles_post_ra>
